<compile_context>
chip_gen: v7x
topology: tpu7x:2x2x1
jax: 0.10.0
libtpu: 0.0.40
codegen_flags: <defaults>
</compile_context>

<pallas_src>
import functools

import jax
import jax.numpy as jnp
from jax.experimental import pallas as pl
from jax.experimental.pallas import tpu as pltpu


# ------------------------------ fused kernel --------------------------------
def _fused_kernel(x_ref, nw_ref, wcat_ref, wo_ref, cos_ref, sin_ref, mask_ref, o_ref,
                  *, hd, eps_norm, eps_attn):
    bt = x_ref.shape[0]                      # batches handled by this program (static)

    # Hoist all constant loads out of the batch loop.
    nw = nw_ref[...]                         # (C, 1)   f32  RMSNorm weight
    wcat = wcat_ref[...]                     # (5hd, C) bf16 fused QKV(+rotary-swap) weight
    wo = wo_ref[...]                         # (C, hd)  bf16 output weight
    cos = cos_ref[...]                       # (hd, S)  f32
    sin = sin_ref[...]                       # (hd, S)  f32
    mask = mask_ref[...]                     # (hd, hd) bf16 block-diagonal head mask

    def phi(t):                              # elu(t)+1, exp guarded on discarded branch
        return jnp.where(t > 0, t + 1.0, jnp.exp(jnp.minimum(t, 0.0)))

    for b in range(bt):                      # static unroll over batches in this program
        xb = x_ref[b]                        # (C, S) f32, feature-major

        # --- RMSNorm over channels (sublane axis) ---
        ms = jnp.mean(xb * xb, axis=0, keepdims=True)                      # (1, S)
        xn = (xb * jax.lax.rsqrt(ms + eps_norm) * nw).astype(jnp.bfloat16)  # (C, S) bf16

        # --- fused projection: [q ; q_swap ; k ; k_swap ; v]^T, each (hd, S) ---
        proj = jnp.dot(wcat, xn, preferred_element_type=jnp.float32)       # (5hd, S) f32
        q, qsw = proj[0:hd], proj[hd:2 * hd]            # sublane-aligned slices (hd % 8 == 0)
        k, ksw = proj[2 * hd:3 * hd], proj[3 * hd:4 * hd]
        v = proj[4 * hd:5 * hd]

        # --- rotary: pure elementwise (pair-swap already folded into the weights) ---
        q = q * cos + qsw * sin
        k = k * cos + ksw * sin

        # --- phi(x) = elu(x) + 1 (f32) ---
        qp = phi(q)                                                         # (hd, S)
        kp = phi(k)                                                         # (hd, S)

        qp_b = qp.astype(jnp.bfloat16)
        kp_b = kp.astype(jnp.bfloat16)
        v_b = v.astype(jnp.bfloat16)

        # --- per-head linear attention in packed feature-major (hd, S) layout ---
        # kvT[j, d] = sum_s V[s, j] * K[s, d]; block-diag mask keeps heads separate.
        kvT = jax.lax.dot_general(v_b, kp_b, (((1,), (1,)), ((), ())),
                                  preferred_element_type=jnp.float32)       # (hd, hd)
        kvT = (kvT * mask).astype(jnp.bfloat16)
        ksum = jnp.sum(kp, axis=1, keepdims=True)                           # (hd, 1) f32
        y = jnp.dot(kvT, qp_b, preferred_element_type=jnp.float32)          # (hd, S) numerator
        z = jnp.dot(mask, (ksum * qp).astype(jnp.bfloat16),
                    preferred_element_type=jnp.float32)                     # (hd, S) denominator
        y = y * pl.reciprocal(z + eps_attn, approx=True)

        # --- output projection (stays feature-major): (C, hd) @ (hd, S) -> (C, S) ---
        o_ref[b] = jnp.dot(wo, y.astype(jnp.bfloat16),
                           preferred_element_type=jnp.float32)


# --------------------------- host-side preparation --------------------------
def _rotary_tables(head_dim, n_heads, seq_len, theta=10000.0):
    inv = 1.0 / theta ** (jnp.arange(0, head_dim, 2, dtype=jnp.float32) / head_dim)
    t = jnp.arange(seq_len, dtype=jnp.float32)
    freqs = jnp.outer(t, inv)                               # (S, D/2)
    cos = jnp.repeat(jnp.cos(freqs), 2, axis=1)             # (S, D) interleave-expanded
    sin = jnp.repeat(jnp.sin(freqs), 2, axis=1)
    # Feature-major (hd, S); head replication kept host-side (see TODO at top for
    # the de-replicated production variant).
    return jnp.tile(cos, (1, n_heads)).T, jnp.tile(sin, (1, n_heads)).T


def _structural_mats(head_dim, n_heads):
    hd = head_dim * n_heads
    i = jnp.arange(hd)
    row, col = i[:, None], i[None, :]
    # signed pair-swap P: (t @ P)[:, 2i] = -t[:, 2i+1]; (t @ P)[:, 2i+1] = +t[:, 2i]
    p = (jnp.where((col == row + 1) & (row % 2 == 0), 1.0, 0.0)
         - jnp.where((col == row - 1) & (row % 2 == 1), 1.0, 0.0)).astype(jnp.float32)
    m = (row // head_dim == col // head_dim).astype(jnp.float32)            # head mask
    return p, m


def prepare_params(params, n_heads, n_kv_heads, head_dim, seq_len):
    """One-time prep: GQA-repeat kv weights, fold rotary pair-swap into the projection
    weights, stack all five projections row-wise, cast GEMM weights to bf16."""
    hd = n_heads * head_dim
    n_rep = n_heads // n_kv_heads

    def rep_heads(w):                        # (Hkv*D, C) -> (Hq*D, C), repeat head blocks
        return jnp.repeat(w.reshape(n_kv_heads, head_dim, -1), n_rep, axis=0).reshape(hd, -1)

    wq = params["wq"]                        # (hd, C)
    wk = rep_heads(params["wk"])
    wv = rep_heads(params["wv"])
    p_swap, head_mask = _structural_mats(head_dim, n_heads)
    w_cat = jnp.concatenate([wq, p_swap.T @ wq, wk, p_swap.T @ wk, wv],
                            axis=0).astype(jnp.bfloat16)                    # (5*hd, C)
    cos, sin = _rotary_tables(head_dim, n_heads, seq_len)                   # (hd, S)
    return dict(norm_w=params["norm_w"].reshape(-1, 1).astype(jnp.float32),  # (C, 1)
                w_cat=w_cat,
                wo=params["wo"].astype(jnp.bfloat16),                        # (C, hd)
                cos=cos, sin=sin,
                head_mask=head_mask.astype(jnp.bfloat16))


# ------------------------------ full forward --------------------------------
def rotary_linear_attention(x_img, prep, n_heads, head_dim, *, batch_tile=None):
    B, C, Himg, Wimg = x_img.shape
    S = Himg * Wimg
    hd = n_heads * head_dim
    if batch_tile is None:
        batch_tile = B           # single program: best on single-TC v5e/v6e.
                                 # On v7x (2 TensorCores) pass batch_tile = B // 2.
    assert B % batch_tile == 0 and hd % 8 == 0

    x = x_img.reshape(B, C, S)   # NCHW-native: no wrapper transpose

    kernel = functools.partial(_fused_kernel, hd=hd, eps_norm=1e-6, eps_attn=1e-6)
    flops = 2 * B * S * (5 * hd * C + 3 * hd * hd + hd * C)
    transcendentals = B * S * (3 * hd + 1)
    bytes_accessed = (2 * B * C * S + 2 * hd * S + C) * 4 + (6 * hd * C + hd * hd) * 2

    out = pl.pallas_call(
        kernel,
        out_shape=jax.ShapeDtypeStruct((B, C, S), jnp.float32),
        grid=(B // batch_tile,),
        in_specs=[
            pl.BlockSpec((batch_tile, C, S), lambda g: (g, 0, 0)),   # x (feature-major)
            pl.BlockSpec((C, 1), lambda g: (0, 0)),                  # RMSNorm weight
            pl.BlockSpec((5 * hd, C), lambda g: (0, 0)),             # fused QKV(+swap) weight
            pl.BlockSpec((C, hd), lambda g: (0, 0)),                 # output weight
            pl.BlockSpec((hd, S), lambda g: (0, 0)),                 # cos table
            pl.BlockSpec((hd, S), lambda g: (0, 0)),                 # sin table
            pl.BlockSpec((hd, hd), lambda g: (0, 0)),                # head block-diag mask
        ],
        out_specs=pl.BlockSpec((batch_tile, C, S), lambda g: (g, 0, 0)),
        compiler_params=pltpu.CompilerParams(dimension_semantics=("parallel",)),
        cost_estimate=pl.CostEstimate(flops=flops, transcendentals=transcendentals,
                                      bytes_accessed=bytes_accessed),
    )(x, prep["norm_w"], prep["w_cat"], prep["wo"], prep["cos"], prep["sin"],
      prep["head_mask"])

    return out.reshape(B, C, Himg, Wimg)


# --------------------------- pure-JAX reference -----------------------------
def _ref_freqs(head_dim, seq_len, theta=10000.0):
    inv = 1.0 / theta ** (jnp.arange(0, head_dim, 2, dtype=jnp.float32) / head_dim)
    t = jnp.arange(seq_len, dtype=jnp.float32)
    freqs = jnp.outer(t, inv)
    return jnp.cos(freqs), jnp.sin(freqs)


def _ref_rotary(x, cos, sin):
    B, S, H, D = x.shape
    xr = x.reshape(B, S, H, D // 2, 2)
    x0, x1 = xr[..., 0], xr[..., 1]
    c = cos[None, :, None, :]
    s = sin[None, :, None, :]
    o0 = x0 * c - x1 * s
    o1 = x0 * s + x1 * c
    return jnp.stack([o0, o1], axis=-1).reshape(B, S, H, D)


def reference_forward(x_img, params, n_heads, n_kv_heads):
    B, C, H, W = x_img.shape
    head_dim = C // n_heads
    n_rep = n_heads // n_kv_heads
    S = H * W
    x = x_img.reshape(B, C, S).transpose(0, 2, 1)
    ms = jnp.mean(x * x, axis=-1, keepdims=True)
    x = x * jax.lax.rsqrt(ms + 1e-6) * params["norm_w"]
    xq = (x @ params["wq"].T).reshape(B, S, n_heads, head_dim)
    xk = (x @ params["wk"].T).reshape(B, S, n_kv_heads, head_dim)
    xv = (x @ params["wv"].T).reshape(B, S, n_kv_heads, head_dim)
    cos, sin = _ref_freqs(head_dim, S)
    xq = _ref_rotary(xq, cos, sin)
    xk = _ref_rotary(xk, cos, sin)
    keys = jnp.repeat(xk, n_rep, axis=2)
    vals = jnp.repeat(xv, n_rep, axis=2)
    q = xq.transpose(0, 2, 1, 3)
    k = keys.transpose(0, 2, 1, 3)
    v = vals.transpose(0, 2, 1, 3)
    phi = lambda a: jnp.where(a > 0, a + 1.0, jnp.exp(a))
    Q, K = phi(q), phi(k)
    KV = jnp.einsum("bhsd,bhsv->bhdv", K, v)
    Ks = K.sum(axis=2)
    Z = jnp.einsum("bhsd,bhd->bhs", Q, Ks)[..., None]
    Y = jnp.einsum("bhsd,bhdv->bhsv", Q, KV) / (Z + 1e-6)
    Y = Y.transpose(0, 2, 1, 3).reshape(B, S, -1)
    out = Y @ params["wo"].T
    return out.transpose(0, 2, 1).reshape(B, C, H, W)


if __name__ == "__main__":
    # Module config (scaled down): dim=32, n_heads=4, n_kv_heads=2, head_dim=8.
    B, C, H, W = 2, 32, 8, 8
    n_heads, n_kv_heads = 4, 2
    head_dim = C // n_heads
    S = H * W

    key = jax.random.PRNGKey(0)
    k1, k2, k3, k4, k5 = jax.random.split(key, 5)
    x = jax.random.normal(k1, (B, C, H, W), jnp.float32)
    params = dict(
        norm_w=jnp.ones((C,), jnp.float32),                                   # RMSNorm weight
        wq=0.05 * jax.random.normal(k2, (n_heads * head_dim, C), jnp.float32),
        wk=0.05 * jax.random.normal(k3, (n_kv_heads * head_dim, C), jnp.float32),
        wv=0.05 * jax.random.normal(k4, (n_kv_heads * head_dim, C), jnp.float32),
        wo=0.05 * jax.random.normal(k5, (C, n_heads * head_dim), jnp.float32),
    )

    prep = prepare_params(params, n_heads, n_kv_heads, head_dim, S)           # one-time prep
    out = rotary_linear_attention(x, prep, n_heads, head_dim)
    out = jax.block_until_ready(out)

    ref = reference_forward(x, params, n_heads, n_kv_heads)
    assert out.shape == (B, C, H, W)
    assert jnp.allclose(out, ref, rtol=2e-2, atol=2e-2), "mismatch vs reference"
    print("KERNEL_OK")
</pallas_src>

<mosaic_0001>
module attributes {stable_mosaic.version = 11 : i64} {
  func.func @_fused_kernel(%arg0: i32, %arg1: memref<2x32x64xf32, #tpu.memory_space<vmem>>, %arg2: memref<32x1xf32, #tpu.memory_space<vmem>>, %arg3: memref<160x32xbf16, #tpu.memory_space<vmem>>, %arg4: memref<32x32xbf16, #tpu.memory_space<vmem>>, %arg5: memref<32x64xf32, #tpu.memory_space<vmem>>, %arg6: memref<32x64xf32, #tpu.memory_space<vmem>>, %arg7: memref<32x32xbf16, #tpu.memory_space<vmem>>, %arg8: memref<2x32x64xf32, #tpu.memory_space<vmem>>) attributes {dimension_semantics = [#tpu.dimension_semantics<parallel>], iteration_bounds = array<i64: 1>, scalar_prefetch = 0 : i64, scratch_operands = 0 : i64, tpu.core_type = #tpu.core_type<tc>, window_params = [{transform_indices = @transform_0, window_bounds = array<i64: 2, 32, 64>}, {pipeline_mode = #tpu.pipeline_mode<synchronous>, transform_indices = @transform_1, window_bounds = array<i64: 32, 1>}, {pipeline_mode = #tpu.pipeline_mode<synchronous>, transform_indices = @transform_2, window_bounds = array<i64: 160, 32>}, {pipeline_mode = #tpu.pipeline_mode<synchronous>, transform_indices = @transform_3, window_bounds = array<i64: 32, 32>}, {pipeline_mode = #tpu.pipeline_mode<synchronous>, transform_indices = @transform_4, window_bounds = array<i64: 32, 64>}, {pipeline_mode = #tpu.pipeline_mode<synchronous>, transform_indices = @transform_5, window_bounds = array<i64: 32, 64>}, {pipeline_mode = #tpu.pipeline_mode<synchronous>, transform_indices = @transform_6, window_bounds = array<i64: 32, 32>}, {transform_indices = @transform_7, window_bounds = array<i64: 2, 32, 64>}]} {
    %c0 = arith.constant 0 : index
    %c0_0 = arith.constant 0 : index
    %0 = vector.load %arg2[%c0, %c0_0] : memref<32x1xf32, #tpu.memory_space<vmem>>, vector<32x1xf32>
    %c0_1 = arith.constant 0 : index
    %c0_2 = arith.constant 0 : index
    %1 = vector.load %arg3[%c0_1, %c0_2] : memref<160x32xbf16, #tpu.memory_space<vmem>>, vector<160x32xbf16>
    %c0_3 = arith.constant 0 : index
    %c0_4 = arith.constant 0 : index
    %2 = vector.load %arg4[%c0_3, %c0_4] : memref<32x32xbf16, #tpu.memory_space<vmem>>, vector<32x32xbf16>
    %c0_5 = arith.constant 0 : index
    %c0_6 = arith.constant 0 : index
    %3 = vector.load %arg5[%c0_5, %c0_6] : memref<32x64xf32, #tpu.memory_space<vmem>>, vector<32x64xf32>
    %c0_7 = arith.constant 0 : index
    %c0_8 = arith.constant 0 : index
    %4 = vector.load %arg6[%c0_7, %c0_8] : memref<32x64xf32, #tpu.memory_space<vmem>>, vector<32x64xf32>
    %c0_9 = arith.constant 0 : index
    %c0_10 = arith.constant 0 : index
    %5 = vector.load %arg7[%c0_9, %c0_10] : memref<32x32xbf16, #tpu.memory_space<vmem>>, vector<32x32xbf16>
    %c0_11 = arith.constant 0 : index
    %c0_12 = arith.constant 0 : index
    %c0_13 = arith.constant 0 : index
    %6 = vector.load %arg1[%c0_11, %c0_12, %c0_13] : memref<2x32x64xf32, #tpu.memory_space<vmem>>, vector<1x32x64xf32>
    %7 = vector.shape_cast %6 : vector<1x32x64xf32> to vector<32x64xf32>
    %8 = arith.mulf %7, %7 : vector<32x64xf32>
    %cst = arith.constant dense<0.000000e+00> : vector<64xf32>
    %9 = vector.multi_reduction <add>, %8, %cst [0] : vector<32x64xf32> to vector<64xf32>
    %10 = vector.shape_cast %9 : vector<64xf32> to vector<1x64xf32>
    %cst_14 = arith.constant 3.200000e+01 : f32
    %11 = vector.broadcast %cst_14 : f32 to vector<1x64xf32>
    %12 = arith.divf %10, %11 : vector<1x64xf32>
    %cst_15 = arith.constant 9.99999997E-7 : f32
    %13 = vector.broadcast %cst_15 : f32 to vector<1x64xf32>
    %14 = arith.addf %12, %13 : vector<1x64xf32>
    %15 = math.rsqrt %14 : vector<1x64xf32>
    %16 = vector.broadcast %15 : vector<1x64xf32> to vector<32x64xf32>
    %17 = arith.mulf %7, %16 : vector<32x64xf32>
    %18 = vector.broadcast %0 : vector<32x1xf32> to vector<32x64xf32>
    %19 = arith.mulf %17, %18 : vector<32x64xf32>
    %20 = arith.truncf %19 : vector<32x64xf32> to vector<32x64xbf16>
    %cst_16 = arith.constant dense<0.000000e+00> : vector<160x64xf32>
    %21 = tpu.matmul %1, %20, %cst_16 {dimension_numbers = #tpu.dot_dimension_numbers<[1], [0], [0], [1], [0, 0, 1, 1], [], []>} : vector<160x32xbf16>, vector<32x64xbf16>, vector<160x64xf32> -> vector<160x64xf32>
    %22 = vector.extract_strided_slice %21 {offsets = [0, 0], sizes = [32, 64], strides = [1, 1]} : vector<160x64xf32> to vector<32x64xf32>
    %23 = vector.extract_strided_slice %21 {offsets = [32, 0], sizes = [32, 64], strides = [1, 1]} : vector<160x64xf32> to vector<32x64xf32>
    %24 = vector.extract_strided_slice %21 {offsets = [64, 0], sizes = [32, 64], strides = [1, 1]} : vector<160x64xf32> to vector<32x64xf32>
    %25 = vector.extract_strided_slice %21 {offsets = [96, 0], sizes = [32, 64], strides = [1, 1]} : vector<160x64xf32> to vector<32x64xf32>
    %26 = vector.extract_strided_slice %21 {offsets = [128, 0], sizes = [32, 64], strides = [1, 1]} : vector<160x64xf32> to vector<32x64xf32>
    %27 = arith.mulf %22, %3 : vector<32x64xf32>
    %28 = arith.mulf %23, %4 : vector<32x64xf32>
    %29 = arith.addf %27, %28 : vector<32x64xf32>
    %30 = arith.mulf %24, %3 : vector<32x64xf32>
    %31 = arith.mulf %25, %4 : vector<32x64xf32>
    %32 = arith.addf %30, %31 : vector<32x64xf32>
    %cst_17 = arith.constant 0.000000e+00 : f32
    %33 = vector.broadcast %cst_17 : f32 to vector<32x64xf32>
    %34 = arith.cmpf ogt, %29, %33 : vector<32x64xf32>
    %cst_18 = arith.constant 1.000000e+00 : f32
    %35 = vector.broadcast %cst_18 : f32 to vector<32x64xf32>
    %36 = arith.addf %29, %35 : vector<32x64xf32>
    %cst_19 = arith.constant 0.000000e+00 : f32
    %37 = vector.broadcast %cst_19 : f32 to vector<32x64xf32>
    %38 = arith.minimumf %29, %37 : vector<32x64xf32>
    %39 = math.exp %38 : vector<32x64xf32>
    %40 = arith.select %34, %36, %39 : vector<32x64xi1>, vector<32x64xf32>
    %cst_20 = arith.constant 0.000000e+00 : f32
    %41 = vector.broadcast %cst_20 : f32 to vector<32x64xf32>
    %42 = arith.cmpf ogt, %32, %41 : vector<32x64xf32>
    %cst_21 = arith.constant 1.000000e+00 : f32
    %43 = vector.broadcast %cst_21 : f32 to vector<32x64xf32>
    %44 = arith.addf %32, %43 : vector<32x64xf32>
    %cst_22 = arith.constant 0.000000e+00 : f32
    %45 = vector.broadcast %cst_22 : f32 to vector<32x64xf32>
    %46 = arith.minimumf %32, %45 : vector<32x64xf32>
    %47 = math.exp %46 : vector<32x64xf32>
    %48 = arith.select %42, %44, %47 : vector<32x64xi1>, vector<32x64xf32>
    %49 = arith.truncf %40 : vector<32x64xf32> to vector<32x64xbf16>
    %50 = arith.truncf %48 : vector<32x64xf32> to vector<32x64xbf16>
    %51 = arith.truncf %26 : vector<32x64xf32> to vector<32x64xbf16>
    %cst_23 = arith.constant dense<0.000000e+00> : vector<32x32xf32>
    %52 = tpu.matmul %51, %50, %cst_23 {dimension_numbers = #tpu.dot_dimension_numbers<[1], [1], [0], [0], [0, 0, 1, 0], [], []>} : vector<32x64xbf16>, vector<32x64xbf16>, vector<32x32xf32> -> vector<32x32xf32>
    %53 = arith.extf %5 : vector<32x32xbf16> to vector<32x32xf32>
    %54 = arith.mulf %52, %53 : vector<32x32xf32>
    %55 = arith.truncf %54 : vector<32x32xf32> to vector<32x32xbf16>
    %cst_24 = arith.constant dense<0.000000e+00> : vector<32xf32>
    %56 = vector.multi_reduction <add>, %48, %cst_24 [1] : vector<32x64xf32> to vector<32xf32>
    %57 = vector.shape_cast %56 : vector<32xf32> to vector<32x1xf32>
    %cst_25 = arith.constant dense<0.000000e+00> : vector<32x64xf32>
    %58 = tpu.matmul %55, %49, %cst_25 {dimension_numbers = #tpu.dot_dimension_numbers<[1], [0], [0], [1], [0, 0, 1, 1], [], []>} : vector<32x32xbf16>, vector<32x64xbf16>, vector<32x64xf32> -> vector<32x64xf32>
    %59 = vector.broadcast %57 : vector<32x1xf32> to vector<32x64xf32>
    %60 = arith.mulf %59, %40 : vector<32x64xf32>
    %61 = arith.truncf %60 : vector<32x64xf32> to vector<32x64xbf16>
    %cst_26 = arith.constant dense<0.000000e+00> : vector<32x64xf32>
    %62 = tpu.matmul %5, %61, %cst_26 {dimension_numbers = #tpu.dot_dimension_numbers<[1], [0], [0], [1], [0, 0, 1, 1], [], []>} : vector<32x32xbf16>, vector<32x64xbf16>, vector<32x64xf32> -> vector<32x64xf32>
    %cst_27 = arith.constant 9.99999997E-7 : f32
    %63 = vector.broadcast %cst_27 : f32 to vector<32x64xf32>
    %64 = arith.addf %62, %63 : vector<32x64xf32>
    %65 = tpu.reciprocal %64 {approx = true} : vector<32x64xf32> -> vector<32x64xf32>
    %66 = arith.mulf %58, %65 : vector<32x64xf32>
    %67 = arith.truncf %66 : vector<32x64xf32> to vector<32x64xbf16>
    %cst_28 = arith.constant dense<0.000000e+00> : vector<32x64xf32>
    %68 = tpu.matmul %2, %67, %cst_28 {dimension_numbers = #tpu.dot_dimension_numbers<[1], [0], [0], [1], [0, 0, 1, 1], [], []>} : vector<32x32xbf16>, vector<32x64xbf16>, vector<32x64xf32> -> vector<32x64xf32>
    %c0_29 = arith.constant 0 : index
    %c0_30 = arith.constant 0 : index
    %c0_31 = arith.constant 0 : index
    %69 = vector.load %arg8[%c0_29, %c0_30, %c0_31] : memref<2x32x64xf32, #tpu.memory_space<vmem>>, vector<1x32x64xf32>
    %70 = vector.shape_cast %69 : vector<1x32x64xf32> to vector<32x64xf32>
    %71 = vector.shape_cast %68 : vector<32x64xf32> to vector<1x32x64xf32>
    tpu.vector_store %arg8[%c0_29, %c0_30, %c0_31], %71 {strides = array<i32>} : memref<2x32x64xf32, #tpu.memory_space<vmem>>, vector<1x32x64xf32>,
    %c1 = arith.constant 1 : index
    %c0_32 = arith.constant 0 : index
    %c0_33 = arith.constant 0 : index
    %72 = vector.load %arg1[%c1, %c0_32, %c0_33] : memref<2x32x64xf32, #tpu.memory_space<vmem>>, vector<1x32x64xf32>
    %73 = vector.shape_cast %72 : vector<1x32x64xf32> to vector<32x64xf32>
    %74 = arith.mulf %73, %73 : vector<32x64xf32>
    %cst_34 = arith.constant dense<0.000000e+00> : vector<64xf32>
    %75 = vector.multi_reduction <add>, %74, %cst_34 [0] : vector<32x64xf32> to vector<64xf32>
    %76 = vector.shape_cast %75 : vector<64xf32> to vector<1x64xf32>
    %cst_35 = arith.constant 3.200000e+01 : f32
    %77 = vector.broadcast %cst_35 : f32 to vector<1x64xf32>
    %78 = arith.divf %76, %77 : vector<1x64xf32>
    %cst_36 = arith.constant 9.99999997E-7 : f32
    %79 = vector.broadcast %cst_36 : f32 to vector<1x64xf32>
    %80 = arith.addf %78, %79 : vector<1x64xf32>
    %81 = math.rsqrt %80 : vector<1x64xf32>
    %82 = vector.broadcast %81 : vector<1x64xf32> to vector<32x64xf32>
    %83 = arith.mulf %73, %82 : vector<32x64xf32>
    %84 = vector.broadcast %0 : vector<32x1xf32> to vector<32x64xf32>
    %85 = arith.mulf %83, %84 : vector<32x64xf32>
    %86 = arith.truncf %85 : vector<32x64xf32> to vector<32x64xbf16>
    %cst_37 = arith.constant dense<0.000000e+00> : vector<160x64xf32>
    %87 = tpu.matmul %1, %86, %cst_37 {dimension_numbers = #tpu.dot_dimension_numbers<[1], [0], [0], [1], [0, 0, 1, 1], [], []>} : vector<160x32xbf16>, vector<32x64xbf16>, vector<160x64xf32> -> vector<160x64xf32>
    %88 = vector.extract_strided_slice %87 {offsets = [0, 0], sizes = [32, 64], strides = [1, 1]} : vector<160x64xf32> to vector<32x64xf32>
    %89 = vector.extract_strided_slice %87 {offsets = [32, 0], sizes = [32, 64], strides = [1, 1]} : vector<160x64xf32> to vector<32x64xf32>
    %90 = vector.extract_strided_slice %87 {offsets = [64, 0], sizes = [32, 64], strides = [1, 1]} : vector<160x64xf32> to vector<32x64xf32>
    %91 = vector.extract_strided_slice %87 {offsets = [96, 0], sizes = [32, 64], strides = [1, 1]} : vector<160x64xf32> to vector<32x64xf32>
    %92 = vector.extract_strided_slice %87 {offsets = [128, 0], sizes = [32, 64], strides = [1, 1]} : vector<160x64xf32> to vector<32x64xf32>
    %93 = arith.mulf %88, %3 : vector<32x64xf32>
    %94 = arith.mulf %89, %4 : vector<32x64xf32>
    %95 = arith.addf %93, %94 : vector<32x64xf32>
    %96 = arith.mulf %90, %3 : vector<32x64xf32>
    %97 = arith.mulf %91, %4 : vector<32x64xf32>
    %98 = arith.addf %96, %97 : vector<32x64xf32>
    %cst_38 = arith.constant 0.000000e+00 : f32
    %99 = vector.broadcast %cst_38 : f32 to vector<32x64xf32>
    %100 = arith.cmpf ogt, %95, %99 : vector<32x64xf32>
    %cst_39 = arith.constant 1.000000e+00 : f32
    %101 = vector.broadcast %cst_39 : f32 to vector<32x64xf32>
    %102 = arith.addf %95, %101 : vector<32x64xf32>
    %cst_40 = arith.constant 0.000000e+00 : f32
    %103 = vector.broadcast %cst_40 : f32 to vector<32x64xf32>
    %104 = arith.minimumf %95, %103 : vector<32x64xf32>
    %105 = math.exp %104 : vector<32x64xf32>
    %106 = arith.select %100, %102, %105 : vector<32x64xi1>, vector<32x64xf32>
    %cst_41 = arith.constant 0.000000e+00 : f32
    %107 = vector.broadcast %cst_41 : f32 to vector<32x64xf32>
    %108 = arith.cmpf ogt, %98, %107 : vector<32x64xf32>
    %cst_42 = arith.constant 1.000000e+00 : f32
    %109 = vector.broadcast %cst_42 : f32 to vector<32x64xf32>
    %110 = arith.addf %98, %109 : vector<32x64xf32>
    %cst_43 = arith.constant 0.000000e+00 : f32
    %111 = vector.broadcast %cst_43 : f32 to vector<32x64xf32>
    %112 = arith.minimumf %98, %111 : vector<32x64xf32>
    %113 = math.exp %112 : vector<32x64xf32>
    %114 = arith.select %108, %110, %113 : vector<32x64xi1>, vector<32x64xf32>
    %115 = arith.truncf %106 : vector<32x64xf32> to vector<32x64xbf16>
    %116 = arith.truncf %114 : vector<32x64xf32> to vector<32x64xbf16>
    %117 = arith.truncf %92 : vector<32x64xf32> to vector<32x64xbf16>
    %cst_44 = arith.constant dense<0.000000e+00> : vector<32x32xf32>
    %118 = tpu.matmul %117, %116, %cst_44 {dimension_numbers = #tpu.dot_dimension_numbers<[1], [1], [0], [0], [0, 0, 1, 0], [], []>} : vector<32x64xbf16>, vector<32x64xbf16>, vector<32x32xf32> -> vector<32x32xf32>
    %119 = arith.extf %5 : vector<32x32xbf16> to vector<32x32xf32>
    %120 = arith.mulf %118, %119 : vector<32x32xf32>
    %121 = arith.truncf %120 : vector<32x32xf32> to vector<32x32xbf16>
    %cst_45 = arith.constant dense<0.000000e+00> : vector<32xf32>
    %122 = vector.multi_reduction <add>, %114, %cst_45 [1] : vector<32x64xf32> to vector<32xf32>
    %123 = vector.shape_cast %122 : vector<32xf32> to vector<32x1xf32>
    %cst_46 = arith.constant dense<0.000000e+00> : vector<32x64xf32>
    %124 = tpu.matmul %121, %115, %cst_46 {dimension_numbers = #tpu.dot_dimension_numbers<[1], [0], [0], [1], [0, 0, 1, 1], [], []>} : vector<32x32xbf16>, vector<32x64xbf16>, vector<32x64xf32> -> vector<32x64xf32>
    %125 = vector.broadcast %123 : vector<32x1xf32> to vector<32x64xf32>
    %126 = arith.mulf %125, %106 : vector<32x64xf32>
    %127 = arith.truncf %126 : vector<32x64xf32> to vector<32x64xbf16>
    %cst_47 = arith.constant dense<0.000000e+00> : vector<32x64xf32>
    %128 = tpu.matmul %5, %127, %cst_47 {dimension_numbers = #tpu.dot_dimension_numbers<[1], [0], [0], [1], [0, 0, 1, 1], [], []>} : vector<32x32xbf16>, vector<32x64xbf16>, vector<32x64xf32> -> vector<32x64xf32>
    %cst_48 = arith.constant 9.99999997E-7 : f32
    %129 = vector.broadcast %cst_48 : f32 to vector<32x64xf32>
    %130 = arith.addf %128, %129 : vector<32x64xf32>
    %131 = tpu.reciprocal %130 {approx = true} : vector<32x64xf32> -> vector<32x64xf32>
    %132 = arith.mulf %124, %131 : vector<32x64xf32>
    %133 = arith.truncf %132 : vector<32x64xf32> to vector<32x64xbf16>
    %cst_49 = arith.constant dense<0.000000e+00> : vector<32x64xf32>
    %134 = tpu.matmul %2, %133, %cst_49 {dimension_numbers = #tpu.dot_dimension_numbers<[1], [0], [0], [1], [0, 0, 1, 1], [], []>} : vector<32x32xbf16>, vector<32x64xbf16>, vector<32x64xf32> -> vector<32x64xf32>
    %c1_50 = arith.constant 1 : index
    %c0_51 = arith.constant 0 : index
    %c0_52 = arith.constant 0 : index
    %135 = vector.load %arg8[%c1_50, %c0_51, %c0_52] : memref<2x32x64xf32, #tpu.memory_space<vmem>>, vector<1x32x64xf32>
    %136 = vector.shape_cast %135 : vector<1x32x64xf32> to vector<32x64xf32>
    %137 = vector.shape_cast %134 : vector<32x64xf32> to vector<1x32x64xf32>
    tpu.vector_store %arg8[%c1_50, %c0_51, %c0_52], %137 {strides = array<i32>} : memref<2x32x64xf32, #tpu.memory_space<vmem>>, vector<1x32x64xf32>,
    return
  }
  func.func @transform_0(%arg0: i32) -> (i32, i32, i32) {
    %c0_i32 = arith.constant 0 : i32
    %c0_i32_0 = arith.constant 0 : i32
    %c0_i32_1 = arith.constant 0 : i32
    return %arg0, %c0_i32, %c0_i32_0 : i32, i32, i32
  }
  func.func @transform_1(%arg0: i32) -> (i32, i32) {
    %c0_i32 = arith.constant 0 : i32
    %c0_i32_0 = arith.constant 0 : i32
    %c0_i32_1 = arith.constant 0 : i32
    return %c0_i32, %c0_i32_0 : i32, i32
  }
  func.func @transform_2(%arg0: i32) -> (i32, i32) {
    %c0_i32 = arith.constant 0 : i32
    %c0_i32_0 = arith.constant 0 : i32
    %c0_i32_1 = arith.constant 0 : i32
    return %c0_i32, %c0_i32_0 : i32, i32
  }
  func.func @transform_3(%arg0: i32) -> (i32, i32) {
    %c0_i32 = arith.constant 0 : i32
    %c0_i32_0 = arith.constant 0 : i32
    %c0_i32_1 = arith.constant 0 : i32
    return %c0_i32, %c0_i32_0 : i32, i32
  }
  func.func @transform_4(%arg0: i32) -> (i32, i32) {
    %c0_i32 = arith.constant 0 : i32
    %c0_i32_0 = arith.constant 0 : i32
    %c0_i32_1 = arith.constant 0 : i32
    return %c0_i32, %c0_i32_0 : i32, i32
  }
  func.func @transform_5(%arg0: i32) -> (i32, i32) {
    %c0_i32 = arith.constant 0 : i32
    %c0_i32_0 = arith.constant 0 : i32
    %c0_i32_1 = arith.constant 0 : i32
    return %c0_i32, %c0_i32_0 : i32, i32
  }
  func.func @transform_6(%arg0: i32) -> (i32, i32) {
    %c0_i32 = arith.constant 0 : i32
    %c0_i32_0 = arith.constant 0 : i32
    %c0_i32_1 = arith.constant 0 : i32
    return %c0_i32, %c0_i32_0 : i32, i32
  }
  func.func @transform_7(%arg0: i32) -> (i32, i32, i32) {
    %c0_i32 = arith.constant 0 : i32
    %c0_i32_0 = arith.constant 0 : i32
    %c0_i32_1 = arith.constant 0 : i32
    return %arg0, %c0_i32, %c0_i32_0 : i32, i32, i32
  }
}

</mosaic_0001>

<bundles_post_ra>
// kernel: tpu_custom_call.1
= control target key start
LH: loop header
LB: loop body
LE: loop exit
PB: predicated region body
PF: predicated region fallthrough
CT: control target
= control target key end

     0   :  { %12 = vsyncpa [#allocation3], 0  ;;  %s1949_s0 = inlined_call_operand.vmem [shape: f32[2,32,64], index: 0, kind: input, shape index: {}]   ;;  %s1950_s1 = inlined_call_operand.vmem [shape: f32[32,1], index: 1, kind: input, shape index: {}]   ;;  %s1951_s2 = inlined_call_operand.vmem [shape: bf16[160,32], index: 2, kind: input, shape index: {}]   ;;  %s1952_s3 = inlined_call_operand.vmem [shape: bf16[32,32], index: 3, kind: input, shape index: {}]   ;;  %s1953_s4 = inlined_call_operand.vmem [shape: f32[32,64], index: 4, kind: input, shape index: {}]   ;;  %s1954_s5 = inlined_call_operand.hbm [shape: f32[32,64], index: 5, kind: input, shape index: {}]   ;;  %s1955_s6 = inlined_call_operand.vmem [shape: bf16[32,32], index: 6, kind: input, shape index: {}]   ;;  %s1956_s7 = inlined_call_operand.hbm [shape: f32[2,32,64], index: 7, kind: output, shape index: {}]  }
   0x1   :  { %13 = vsyncpa [#allocation4], 0  ;;  %s1543_s24 = smov [#allocation2]   ;;  %s1495_s28 = scalar_lea.hbm %s1954_s5, 512 }
   0x2   :  { %s29_s25 = sshll.u32 %s1543_s24, 4  ;;  %p1496_p0 = scmp.ne.s32.totalorder %s1954_s5, %s1495_s28  ;;  %s30_s25 = int_to_ptr.vmem [resolvable:$true] %s29_s25 }
   0x3   :  { %p1499_p1 = scmp.lt.u32.totalorder %s1495_s28, %s1954_s5 }
   0x5   :  { %p1501_p2 = pnand %p1499_p1, %p1496_p0 }
   0x7   :  { %1504 = shalt.err (!%p1501_p2)
}
   0x8   :  { %s1505_s10 = scalar_lea.vmem %s30_s25, 512  ;;  %p1510_p4 = scmp.lt.s32.totalorder %s30_s25, %s30_s25 }
   0x9   :  { %p1506_p3 = scmp.ne.s32.totalorder %s30_s25, %s1505_s10  ;;  %p1511_p5 = scmp.lt.s32.totalorder %s1505_s10, %s1505_s10 }
   0xb   :  { %p1512_p6 = por %p1511_p5, %p1510_p4 }
   0xd   :  { %p1513_p7 = pnand %p1512_p6, %p1506_p3 }
   0xf   :  { %1516 = shalt.err (!%p1513_p7)
}
  0x10   :  { %s1544_s11 = smov 128   ;;  %s1545_s12 = smov 8  }
  0x11   :  { %35 = dma.hbm_to_vmem [thread:$0]  %s1954_s5, 512, %s30_s25, [#allocation3], %s1544_s11, %s1544_s11, %s1545_s12  }
  0x12   :  { %1539 = dma.done.wait [#allocation3], 512  }
  0x13   :  { %1540 = vsyncadd [#allocation3], 4294966784  ;;  %v1546_v0 = vmov 0   ;;  %v44_v1 = vld [vmem:[%s1950_s1 + $0x10] sm:$0xff]  ;;  %v42_v2 = vld [vmem:[%s1950_s1] sm:$0xff]  ;;  %vm188_vm0 = vcmask 261120  }
  0x14   :  { %1426 = vset.pattern.permute.xlu1 %v1546_v0  ;;  %1425 = vset.pattern.permute.xlu0 %v1546_v0  ;;  %v45_v3 = vld [vmem:[%s1950_s1 + $0x18] sm:$0xff]  ;;  %v43_v4 = vld [vmem:[%s1950_s1 + $0x8] sm:$0xff]  ;;  %v1618_v5 = vld [vmem:[%s1951_s2] sm:$0xff]   ;;  %vm90_vm1 = vcmask 523264  }
  0x15   :  { %124 = vperm.xlu1 %1426, %v44_v1   ;;  %114 = vperm.xlu0 %1425, %v42_v2   ;;  %v82_v6 = vld [vmem:[%s1949_s0] sm:$0xff]  ;;  %v83_v7 = vld [vmem:[%s1949_s0 + $0x8] sm:$0xff]  ;;  %v84_v10 = vld [vmem:[%s1949_s0 + $0x10] sm:$0xff] }
  0x16   :  { %1308 = vmatprep.mubr.msk.bf16.mxu0 %vm188_vm0, %v1618_v5  ;;  %v86_v8 = vmul.f32 %v82_v6, %v82_v6  ;;  %v87_v9 = vmul.f32 %v83_v7, %v83_v7  ;;  %v1226_v11 = vld [vmem:[%s1949_s0 + $0x20] sm:$0xff]  ;;  %v1227_v12 = vld [vmem:[%s1949_s0 + $0x28] sm:$0xff]  ;;  %v88_v13 = vmul.f32 %v84_v10, %v84_v10  ;;  %v85_v16 = vld [vmem:[%s1949_s0 + $0x18] sm:$0xff] }
  0x17   :  { %v703_v17 = vmul.f32 %v1226_v11, %v1226_v11  ;;  %v704_v18 = vmul.f32 %v1227_v12, %v1227_v12  ;;  %v1228_v19 = vld [vmem:[%s1949_s0 + $0x30] sm:$0xff]  ;;  %v89_v21 = vmul.f32 %v85_v16, %v85_v16  ;;  %v1229_v26 = vld [vmem:[%s1949_s0 + $0x38] sm:$0xff] }
  0x18   :  { %v91_v14 = vsel %vm90_vm1, %v86_v8, 0.0  ;;  %v92_v15 = vsel %vm90_vm1, %v87_v9, 0.0  ;;  %v94_v22 = vsel %vm90_vm1, %v88_v13, 0.0  ;;  %v705_v23 = vmul.f32 %v1228_v19, %v1228_v19 }
  0x19   :  { %129 = vperm.xlu1 %1426, %v45_v3   ;;  %119 = vperm.xlu0 %1425, %v43_v4   ;;  %v93_v20 = vadd.f32 %v92_v15, %v91_v14  ;;  %v707_v24 = vsel %vm90_vm1, %v703_v17, 0.0  ;;  %v708_v25 = vsel %vm90_vm1, %v704_v18, 0.0  ;;  %v96_v28 = vsel %vm90_vm1, %v89_v21, 0.0  ;;  %v1430_v17 = vld [vmem:[%s1951_s2 + $0x18] sm:$0xff]   ;;  %v1431_v18 = vld [vmem:[%s1951_s2 + $0x20] sm:$0xff]  }
  0x1a   :  { %v709_v29 = vadd.f32 %v708_v25, %v707_v24  ;;  %v706_v30 = vmul.f32 %v1229_v26, %v1229_v26  ;;  %v710_v31 = vsel %vm90_vm1, %v705_v23, 0.0  ;;  %v1434_v21 = vld [vmem:[%s1951_s2 + $0x38] sm:$0xff]   ;;  %v1436_v23 = vld [vmem:[%s1951_s2 + $0x48] sm:$0xff]  }
  0x1b   :  { %v95_v27 = vadd.f32 %v94_v22, %v93_v20  ;;  %v1433_v20 = vld [vmem:[%s1951_s2 + $0x30] sm:$0xff]   ;;  %v1435_v22 = vld [vmem:[%s1951_s2 + $0x40] sm:$0xff]  }
  0x1c   :  { %v711_v33 = vadd.f32 %v710_v31, %v709_v29  ;;  %v712_v34 = vsel %vm90_vm1, %v706_v30, 0.0  ;;  %v1711_v29 = vld [vmem:[%s1953_s4] sm:$0xff]  ;;  %v1718_v31 = vld [vmem:[%s1953_s4 + $0x18] sm:$0xff] }
  0x1d   :  { %v97_v32 = vadd.f32 %v96_v28, %v95_v27  ;;  %v1704_v27 = vld [vmem:[%s1953_s4 + $0x10] sm:$0xff]  ;;  %v1713_v30 = vld [vmem:[#allocation2] sm:$0xff] }
  0x1e   :  { %v713_v36 = vadd.f32 %v712_v34, %v711_v33  ;;  %v1706_v28 = vld [vmem:[#allocation2 + $0x10] sm:$0xff]  ;;  %v1720_v33 = vld [vmem:[#allocation2 + $0x18] sm:$0xff] }
  0x1f   :  { %v98_v35 = vrot.slane %v97_v32, 4 }
  0x20   :  { %v714_v38 = vrot.slane %v713_v36, 4 }
  0x21   :  { %v99_v37 = vadd.f32 %v98_v35, %v97_v32  ;;  %v1726_v35 = vld [vmem:[%s1953_s4 + $0x8] sm:$0xff] }
  0x22   :  { %v715_v40 = vadd.f32 %v714_v38, %v713_v36  ;;  %v1729_v38 = vld [vmem:[#allocation2 + $0x8] sm:$0xff] }
  0x23   :  { %v100_v39 = vrot.slane %v99_v37, 2 }
  0x24   :  { %v716_v42 = vrot.slane %v715_v40, 2 }
  0x25   :  { %v101_v41 = vadd.f32 %v100_v39, %v99_v37 }
  0x26   :  { %v717_v44 = vadd.f32 %v716_v42, %v715_v40 }
  0x27   :  { %v102_v43 = vrot.slane %v101_v41, 1 }
  0x28   :  { %v718_v46 = vrot.slane %v717_v44, 1 }
  0x29   :  { %v103_v45 = vadd.f32 %v102_v43, %v101_v41 }
  0x2a   :  { %v719_v48 = vadd.f32 %v718_v46, %v717_v44 }
  0x2b   :  { %v105_v47 = vmul.f32 0.03125, %v103_v45 }
  0x2c   :  { %v720_v50 = vmul.f32 0.03125, %v719_v48 }
  0x2d   :  { %v106_v49 = vadd.f32 1e-06, %v105_v47 }
  0x2e   :  { %v721_v51 = vadd.f32 1e-06, %v720_v50 }
  0x2f   :  { %1443 = vrsqrt.f32 %v106_v49 }
  0x30   :  { %1445 = vrsqrt.f32 %v721_v51 }
  0x39   :  { %v1444_v52 = vpop.eup %1443 }
  0x3a   :  { %v110_v55 = vmul.f32 %v1444_v52, %v84_v10  ;;  %v108_v56 = vmul.f32 %v1444_v52, %v82_v6  ;;  %v111_v57 = vmul.f32 %v1444_v52, %v85_v16  ;;  %v109_v58 = vmul.f32 %v1444_v52, %v83_v7  ;;  %v1446_v59 = vpop.eup %1445 }
  0x3b   :  { %v724_v61 = vmul.f32 %v1446_v59, %v1227_v12  ;;  %v723_v3 = vmul.f32 %v1446_v59, %v1226_v11  ;;  %v725_v8 = vmul.f32 %v1446_v59, %v1228_v19  ;;  %v726_v9 = vmul.f32 %v1446_v59, %v1229_v26  ;;  %v1428_v12 = vld [vmem:[%s1951_s2 + $0x8] sm:$0xff]   ;;  %v1429_v11 = vld [vmem:[%s1951_s2 + $0x10] sm:$0xff]  }
  0x3c   :  { %v1432_v19 = vld [vmem:[%s1951_s2 + $0x28] sm:$0xff]  }
  0x94   :  { %v125_v53 = vpop.permute.xlu1 %124  ;;  %v115_v54 = vpop.permute.xlu0 %114 }
  0x95   :  { %v134_v63 = vmul.f32 %v125_v53, %v110_v55  ;;  %v132_v0 = vmul.f32 %v115_v54, %v108_v56  ;;  %v727_v10 = vmul.f32 %v723_v3, %v115_v54  ;;  %v729_v6 = vmul.f32 %v725_v8, %v125_v53 }
  0x98   :  { %v130_v60 = vpop.permute.xlu1 %129  ;;  %v120_v62 = vpop.permute.xlu0 %119 }
  0x99   :  { %v135_v1 = vmul.f32 %v130_v60, %v111_v57  ;;  %v133_v2 = vmul.f32 %v120_v62, %v109_v58  ;;  %v728_v14 = vmul.f32 %v724_v61, %v120_v62  ;;  %v730_v7 = vmul.f32 %v726_v9, %v130_v60 }
  0x9b   :  { %v136_v4 = vpack.c.bf16 %v133_v2, %v132_v0  ;;  %v137_v13 = vpack.c.bf16 %v135_v1, %v134_v63  ;;  %v731_v15 = vpack.c.bf16 %v728_v14, %v727_v10  ;;  %v732_v16 = vpack.c.bf16 %v730_v7, %v729_v6 }
  0x9d   :  { %1304 = vmatprep.subr.bf16.mxu0 %v136_v4 }
  0x9e   :  { %1305 = vmatpush3.bf16.msra.mxu0 %v136_v4 }
  0x9f   :  { %1306 = vmatprep.subr.bf16.mxu0 %v137_v13 }
  0xa2   :  { %1307 = vmatpush3.bf16.msra.mxu0 %v137_v13 }
  0xa3   :  { %1360 = vmatprep.subr.bf16.mxu0 %v731_v15 }
  0xa5   :  { %1309 = vmatmul.mubr.msk.bf16.vlgmr.msra.gmra.mrb[0].mxu0 %vm188_vm0, %v1428_v12 }
  0xa6   :  { %1361 = vmatpush3.bf16.msra.mxu0 %v731_v15  ;;  %1312 = vmatprep.mubr.msk.bf16.mxu0 %vm188_vm0, %v1429_v11 }
  0xa7   :  { %1362 = vmatprep.subr.bf16.mxu0 %v732_v16 }
  0xaa   :  { %1363 = vmatpush3.bf16.msra.mxu0 %v732_v16 }
  0xad   :  { %1313 = vmatmul.mubr.msk.bf16.gmra.mrb[4].mxu0 %vm188_vm0, %v1430_v17 }
  0xae   :  { %1316 = vmatprep.mubr.msk.bf16.mxu0 %vm188_vm0, %v1431_v18 }
  0xb5   :  { %1317 = vmatmul.mubr.msk.bf16.gmra.mrb[8].mxu0 %vm188_vm0, %v1432_v19 }
  0xb6   :  { %1320 = vmatprep.mubr.msk.bf16.mxu0 %vm188_vm0, %v1433_v20 }
  0xbd   :  { %1321 = vmatmul.mubr.msk.bf16.gmra.mrb[12].mxu0 %vm188_vm0, %v1434_v21 }
  0xbe   :  { %1324 = vmatprep.mubr.msk.bf16.mxu0 %vm188_vm0, %v1435_v22 }
  0xc5   :  { %1325 = vmatmul.mubr.msk.bf16.gmra.mrb[16].mxu0 %vm188_vm0, %v1436_v23 }
  0xc6   :  { %1364 = vmatprep.mubr.msk.bf16.mxu0 %vm188_vm0, %v1618_v5 }
  0xcd   :  { %1365 = vmatmul.mubr.msk.bf16.vlgmr.msra.gmra.mrb[20].mxu0 %vm188_vm0, %v1428_v12 }
  0xce   :  { %1368 = vmatprep.mubr.msk.bf16.mxu0 %vm188_vm0, %v1429_v11 }
  0xd5   :  { %1369 = vmatmul.mubr.msk.bf16.gmra.mrb[24].mxu0 %vm188_vm0, %v1430_v17 }
  0xd6   :  { %1372 = vmatprep.mubr.msk.bf16.mxu0 %vm188_vm0, %v1431_v18 }
  0xdd   :  { %1373 = vmatmul.mubr.msk.bf16.gmra.mrb[28].mxu0 %vm188_vm0, %v1432_v19 }
  0xde   :  { %1376 = vmatprep.mubr.msk.bf16.mxu0 %vm188_vm0, %v1433_v20 }
  0xe5   :  { %1377 = vmatmul.mubr.msk.bf16.gmra.mrb[32].mxu0 %vm188_vm0, %v1434_v21 }
  0xe6   :  { %1380 = vmatprep.mubr.msk.bf16.mxu0 %vm188_vm0, %v1435_v22 }
  0xed   :  { %1381 = vmatmul.mubr.msk.bf16.gmra.mrb[36].mxu0 %vm188_vm0, %v1436_v23 }
 0x178   :  { %v1310_v24 = vpop.f32.mrb[0].mxu0 }
 0x179   :  { %v253_v5 = vpop.f32.mrb[1].mxu0  ;;  %v334_v34 = vmul.f32 %v1310_v24, %v1704_v27 }
 0x17a   :  { %v1311_v25 = vpop.f32.mrb[2].mxu0  ;;  %v332_v39 = vmul.f32 %v253_v5, %v1711_v29 }
 0x17b   :  { %v256_v26 = vpop.f32.mrb[3].mxu0  ;;  %v335_v42 = vmul.f32 %v1311_v25, %v1718_v31 }
 0x17c   :  { %v333_v46 = vmul.f32 %v256_v26, %v1726_v35 }
 0x180   :  { %v1314_v32 = vpop.f32.mrb[4].mxu0 }
 0x181   :  { %v338_v36 = vmul.f32 %v1314_v32, %v1706_v28  ;;  %v269_v37 = vpop.f32.mrb[5].mxu0 }
 0x182   :  { %v336_v40 = vmul.f32 %v269_v37, %v1713_v30  ;;  %v1315_v41 = vpop.f32.mrb[6].mxu0 }
 0x183   :  { %v1734_v43 = vadd.f32 %v338_v36, %v334_v34  ;;  %v339_v44 = vmul.f32 %v1315_v41, %v1720_v33  ;;  %v272_v45 = vpop.f32.mrb[7].mxu0 }
 0x184   :  { %v1738_v47 = vadd.f32 %v336_v40, %v332_v39  ;;  %v337_v48 = vmul.f32 %v272_v45, %v1729_v38 }
 0x185   :  { %v1741_v49 = vadd.f32 %v339_v44, %v335_v42  ;;  %v366_v32 = vmin.f32 %v1734_v43, 0.0  ;;  %vm358_vm9 = vcmp.gt.f32.partialorder %v1734_v43, 0.0 }
 0x186   :  { %v1743_v50 = vadd.f32 %v337_v48, %v333_v46  ;;  %v364_v22 = vmin.f32 %v1738_v47, 0.0  ;;  %vm356_vm7 = vcmp.gt.f32.partialorder %v1738_v47, 0.0 }
 0x187   :  { %v367_v5 = vmin.f32 %v1741_v49, 0.0  ;;  %vm359_vm8 = vcmp.gt.f32.partialorder %v1741_v49, 0.0 }
 0x188   :  { %v1318_v51 = vpop.f32.mrb[8].mxu0  ;;  %v365_v17 = vmin.f32 %v1743_v50, 0.0  ;;  %v368_v25 = vmul.f32 1.442695, %v364_v22  ;;  %vm357_vm6 = vcmp.gt.f32.partialorder %v1743_v50, 0.0 }
 0x189   :  { %v285_v52 = vpop.f32.mrb[9].mxu0  ;;  %v346_v56 = vmul.f32 %v1318_v51, %v1704_v27  ;;  %v374_v34 = vmul.f32 1.442695, %v367_v5 }
 0x18a   :  { %v1319_v53 = vpop.f32.mrb[10].mxu0  ;;  %v344_v59 = vmul.f32 %v285_v52, %v1711_v29  ;;  %v370_v24 = vmul.f32 1.442695, %v365_v17 }
 0x18b   :  { %v288_v54 = vpop.f32.mrb[11].mxu0  ;;  %v347_v62 = vmul.f32 %v1319_v53, %v1718_v31 }
 0x18c   :  { %v345_v2 = vmul.f32 %v288_v54, %v1726_v35  ;;  %v372_v54 = vmul.f32 1.442695, %v366_v32 }
 0x190   :  { %v1322_v55 = vpop.f32.mrb[12].mxu0 }
 0x191   :  { %v350_v57 = vmul.f32 %v1322_v55, %v1706_v28  ;;  %v301_v58 = vpop.f32.mrb[13].mxu0 }
 0x192   :  { %v348_v60 = vmul.f32 %v301_v58, %v1713_v30  ;;  %v1323_v61 = vpop.f32.mrb[14].mxu0 }
 0x193   :  { %v354_v63 = vadd.f32 %v350_v57, %v346_v56  ;;  %v351_v0 = vmul.f32 %v1323_v61, %v1720_v33  ;;  %v304_v1 = vpop.f32.mrb[15].mxu0 }
 0x194   :  { %v352_v3 = vadd.f32 %v348_v60, %v344_v59  ;;  %v349_v4 = vmul.f32 %v304_v1, %v1729_v38  ;;  %v361_v60 = vadd.f32 1.0, %v1743_v50  ;;  %v363_v50 = vadd.f32 1.0, %v1741_v49 }
 0x195   :  { %v390_v8 = vmin.f32 %v354_v63, 0.0  ;;  %v355_v9 = vadd.f32 %v351_v0, %v347_v62  ;;  %v386_v40 = vadd.f32 1.0, %v354_v63  ;;  %vm382_vm3 = vcmp.gt.f32.partialorder %v354_v63, 0.0 }
 0x196   :  { %v388_v13 = vmin.f32 %v352_v3, 0.0  ;;  %v353_v14 = vadd.f32 %v349_v4, %v345_v2  ;;  %v384_v36 = vadd.f32 1.0, %v352_v3  ;;  %vm380_vm2 = vcmp.gt.f32.partialorder %v352_v3, 0.0 }
 0x197   :  { %v396_v10 = vmul.f32 1.442695, %v390_v8  ;;  %v391_v6 = vmin.f32 %v355_v9, 0.0  ;;  %v387_v39 = vadd.f32 1.0, %v355_v9  ;;  %vm383_vm4 = vcmp.gt.f32.partialorder %v355_v9, 0.0 }
 0x198   :  { %v392_v7 = vmul.f32 1.442695, %v388_v13  ;;  %v389_v15 = vmin.f32 %v353_v14, 0.0  ;;  %v1753_v12 = vpop.f32.mrb[16].mxu0  ;;  %v385_v44 = vadd.f32 1.0, %v353_v14  ;;  %vm381_vm5 = vcmp.gt.f32.partialorder %v353_v14, 0.0 }
 0x199   :  { %1447 = vpow2.f32 %v396_v10  ;;  %v398_v11 = vmul.f32 1.442695, %v391_v6  ;;  %v317_v16 = vpop.f32.mrb[17].mxu0  ;;  %v360_v63 = vadd.f32 1.0, %v1738_v47  ;;  %v362_v9 = vadd.f32 1.0, %v1734_v43 }
 0x19a   :  { %1449 = vpow2.f32 %v392_v7  ;;  %v394_v18 = vmul.f32 1.442695, %v389_v15  ;;  %v1756_v19 = vpop.f32.mrb[18].mxu0 }
 0x19b   :  { %1451 = vpow2.f32 %v398_v11  ;;  %v409_v20 = vpack.c.bf16 %v1756_v19, %v1753_v12  ;;  %v320_v21 = vpop.f32.mrb[19].mxu0 }
 0x19c   :  { %1453 = vpow2.f32 %v394_v18  ;;  %v408_v23 = vpack.c.bf16 %v320_v21, %v317_v16 }
 0x19d   :  { %1455 = vpow2.f32 %v370_v24 }
 0x19e   :  { %1332 = vmatprep.mubr.msk.bf16.mxu1 %vm90_vm1, %v408_v23  ;;  %1457 = vpow2.f32 %v368_v25 }
 0x19f   :  { %1459 = vpow2.f32 %v374_v34 }
 0x1a0   :  { %1461 = vpow2.f32 %v372_v54  ;;  %v1366_v49 = vpop.f32.mrb[20].mxu0 }
 0x1a1   :  { %v767_v10 = vpop.f32.mrb[21].mxu0  ;;  %v848_v7 = vmul.f32 %v1366_v49, %v1704_v27 }
 0x1a2   :  { %v1367_v6 = vpop.f32.mrb[22].mxu0  ;;  %v846_v43 = vmul.f32 %v767_v10, %v1711_v29 }
 0x1a3   :  { %v1448_v26 = vpop.eup %1447  ;;  %v770_v15 = vpop.f32.mrb[23].mxu0  ;;  %v849_v16 = vmul.f32 %v1367_v6, %v1718_v31 }
 0x1a4   :  { %v1450_v37 = vpop.eup %1449  ;;  %v402_v48 = vsel %vm382_vm3, %v386_v40, %v1448_v26  ;;  %v847_v18 = vmul.f32 %v770_v15, %v1726_v35 }
 0x1a5   :  { %v1452_v41 = vpop.eup %1451  ;;  %v400_v42 = vsel %vm380_vm2, %v384_v36, %v1450_v37  ;;  %v487_v57 = vsel %vm90_vm1, %v402_v48, 0.0 }
 0x1a6   :  { %v1454_v45 = vpop.eup %1453  ;;  %v481_v46 = vsel %vm90_vm1, %v400_v42, 0.0  ;;  %v403_v51 = vsel %vm383_vm4, %v387_v39, %v1452_v41 }
 0x1a7   :  { %482 = vadd.xlane.f32.xlu0 %v481_v46  ;;  %v401_v52 = vsel %vm381_vm5, %v385_v44, %v1454_v45  ;;  %v407_v53 = vpack.c.bf16 %v403_v51, %v402_v48  ;;  %v1456_v59 = vpop.eup %1455  ;;  %v490_v62 = vsel %vm90_vm1, %v403_v51, 0.0 }
 0x1a8   :  { %v484_v55 = vsel %vm90_vm1, %v401_v52, 0.0  ;;  %v406_v56 = vpack.c.bf16 %v401_v52, %v400_v42  ;;  %v1458_v61 = vpop.eup %1457  ;;  %v1774_v0 = vsel %vm357_vm6, %v361_v60, %v1456_v59  ;;  %v1370_v11 = vpop.f32.mrb[24].mxu0 }
 0x1a9   :  { %485 = vadd.xlane.f32.xlu1 %v484_v55  ;;  %v1777_v1 = vsel %vm356_vm7, %v360_v63, %v1458_v61  ;;  %v420_v2 = vsel %vm90_vm1, %v407_v53, 0  ;;  %v1460_v4 = vpop.eup %1459  ;;  %v852_v12 = vmul.f32 %v1370_v11, %v1706_v28  ;;  %v783_v17 = vpop.f32.mrb[25].mxu0 }
 0x1aa   :  { %1416 = vmatprep.subr.msk.bf16.mxu1 %vm90_vm1, %v406_v56  ;;  %v417_v58 = vsel %vm90_vm1, %v406_v56, 0  ;;  %v404_v3 = vpack.c.bf16 %v1774_v0, %v1777_v1  ;;  %v1462_v8 = vpop.eup %1461  ;;  %v1785_v13 = vsel %vm359_vm8, %v363_v50, %v1460_v4  ;;  %v850_v19 = vmul.f32 %v783_v17, %v1713_v30 }
 0x1ab   :  { %488 = vadd.xlane.f32.xlu0 %v487_v57  ;;  %1329 = vmatpush3.bf16.xpose.msra.mxu1 %v417_v58  ;;  %v1788_v47 = vsel %vm358_vm9, %v362_v9, %v1462_v8  ;;  %v1802_v21 = vadd.f32 %v852_v12, %v848_v7 }
 0x1ac   :  { %1417 = vmatprep.subr.msk.bf16.mxu1 %vm90_vm1, %v407_v53  ;;  %v405_v14 = vpack.c.bf16 %v1785_v13, %v1788_v47  ;;  %v1805_v24 = vadd.f32 %v850_v19, %v846_v43 }
 0x1ad   :  { %vm872_vm2 = vcmp.gt.f32.partialorder %v1802_v21, 0.0 }
 0x1ae   :  { %vm870_vm14 = vcmp.gt.f32.partialorder %v1805_v24, 0.0 }
 0x1af   :  { %491 = vadd.xlane.f32.xlu0 %v490_v62 }
 0x1b3   :  { %1331 = vmatpush3.bf16.xpose.msra.mxu1 %v420_v2  ;;  %v878_v2 = vmin.f32 %v1805_v24, 0.0 }
 0x1b4   :  { %1336 = vmatprep.subr.bf16.mxu1 %v404_v3 }
 0x1ba   :  { %1333 = vmatmul.mubr.msk.bf16.vlgmr.msra.gmra.mrb[0].mxu1 %vm90_vm1, %v409_v20  ;;  %v1371_v20 = vpop.f32.mrb[26].mxu0 }
 0x1bb   :  { %1337 = vmatpush3.bf16.msra.mxu1 %v404_v3  ;;  %v853_v22 = vmul.f32 %v1371_v20, %v1720_v33  ;;  %v786_v23 = vpop.f32.mrb[27].mxu0 }
 0x1bc   :  { %1338 = vmatprep.subr.bf16.mxu1 %v405_v14  ;;  %v851_v5 = vmul.f32 %v786_v23, %v1729_v38  ;;  %v1374_v25 = vpop.f32.mrb[28].mxu0 }
 0x1bd   :  { %v1808_v26 = vadd.f32 %v853_v22, %v849_v16  ;;  %v799_v32 = vpop.f32.mrb[29].mxu0  ;;  %v860_v37 = vmul.f32 %v1374_v25, %v1704_v27  ;;  %v874_v22 = vadd.f32 1.0, %v1805_v24 }
 0x1be   :  { %v1810_v34 = vadd.f32 %v851_v5, %v847_v18  ;;  %v1375_v36 = vpop.f32.mrb[30].mxu0  ;;  %v858_v40 = vmul.f32 %v799_v32, %v1711_v29 }
 0x1bf   :  { %1339 = vmatpush3.bf16.msra.mxu1 %v405_v14  ;;  %v802_v39 = vpop.f32.mrb[31].mxu0  ;;  %v861_v42 = vmul.f32 %v1375_v36, %v1718_v31  ;;  %vm873_vm3 = vcmp.gt.f32.partialorder %v1808_v26, 0.0 }
 0x1c0   :  { %v1378_v41 = vpop.f32.mrb[32].mxu0  ;;  %v859_v46 = vmul.f32 %v802_v39, %v1726_v35  ;;  %v879_v50 = vmin.f32 %v1810_v34, 0.0  ;;  %vm871_vm15 = vcmp.gt.f32.partialorder %v1810_v34, 0.0  ;;  %v875_v32 = vadd.f32 1.0, %v1810_v34 }
 0x1c1   :  { %v864_v44 = vmul.f32 %v1378_v41, %v1706_v28  ;;  %v815_v45 = vpop.f32.mrb[33].mxu0  ;;  %v1849_v41 = vld [vmem:[%s1955_s6] sm:$0xff]  }
 0x1c2   :  { %v862_v48 = vmul.f32 %v815_v45, %v1713_v30  ;;  %v1379_v51 = vpop.f32.mrb[34].mxu0  ;;  %v884_v15 = vmul.f32 1.442695, %v879_v50  ;;  %v471_v34 = vunpack.c.l.bf16 %v1849_v41  ;;  %v472_v45 = vunpack.c.h.bf16 %v1849_v41 }
 0x1c3   :  { %v868_v52 = vadd.f32 %v864_v44, %v860_v37  ;;  %v865_v53 = vmul.f32 %v1379_v51, %v1720_v33  ;;  %v818_v54 = vpop.f32.mrb[35].mxu0 }
 0x1c4   :  { %v866_v55 = vadd.f32 %v862_v48, %v858_v40  ;;  %v863_v27 = vmul.f32 %v818_v54, %v1729_v38  ;;  %v1844_v40 = vld [vmem:[%s1955_s6 + $0x8] sm:$0xff]  }
 0x1c5   :  { %v904_v56 = vmin.f32 %v868_v52, 0.0  ;;  %v869_v29 = vadd.f32 %v865_v53, %v861_v42  ;;  %v900_v4 = vadd.f32 1.0, %v868_v52  ;;  %vm896_vm11 = vcmp.gt.f32.partialorder %v868_v52, 0.0 }
 0x1c6   :  { %v902_v57 = vmin.f32 %v866_v55, 0.0  ;;  %v867_v58 = vadd.f32 %v863_v27, %v859_v46  ;;  %v898_v3 = vadd.f32 1.0, %v866_v55  ;;  %vm894_vm10 = vcmp.gt.f32.partialorder %v866_v55, 0.0 }
 0x1c7   :  { %v910_v31 = vmul.f32 1.442695, %v904_v56  ;;  %v905_v59 = vmin.f32 %v869_v29, 0.0  ;;  %v901_v8 = vadd.f32 1.0, %v869_v29  ;;  %vm897_vm12 = vcmp.gt.f32.partialorder %v869_v29, 0.0 }
 0x1c8   :  { %v906_v28 = vmul.f32 1.442695, %v902_v57  ;;  %v903_v60 = vmin.f32 %v867_v58, 0.0  ;;  %v899_v14 = vadd.f32 1.0, %v867_v58  ;;  %vm895_vm13 = vcmp.gt.f32.partialorder %v867_v58, 0.0 }
 0x1c9   :  { %1463 = vpow2.f32 %v910_v31  ;;  %v912_v35 = vmul.f32 1.442695, %v905_v59  ;;  %v473_v24 = vunpack.c.l.bf16 %v1844_v40  ;;  %v474_v42 = vunpack.c.h.bf16 %v1844_v40 }
 0x1ca   :  { %1465 = vpow2.f32 %v906_v28  ;;  %v908_v30 = vmul.f32 1.442695, %v903_v60 }
 0x1cb   :  { %1467 = vpow2.f32 %v912_v35  ;;  %v1877_v35 = vld [vmem:[%s1952_s3] sm:$0xff]  }
 0x1cc   :  { %1469 = vpow2.f32 %v908_v30 }
 0x1d3   :  { %v1464_v9 = vpop.eup %1463 }
 0x1d4   :  { %v1466_v49 = vpop.eup %1465  ;;  %v916_v6 = vsel %vm896_vm11, %v900_v4, %v1464_v9 }
 0x1d5   :  { %v914_v10 = vsel %vm894_vm10, %v898_v3, %v1466_v49  ;;  %v997_v19 = vsel %vm90_vm1, %v916_v6, 0.0 }
 0x1d6   :  { %v991_v43 = vsel %vm90_vm1, %v914_v10, 0.0 }
 0x1d7   :  { %992 = vadd.xlane.f32.xlu1 %v991_v43 }
 0x1db   :  { %998 = vadd.xlane.f32.xlu1 %v997_v19 }
 0x234   :  { %v483_v61 = vpop.xlane.xlu0 %482 }
 0x235   :  { %v548_v33 = vmul.f32 %v483_v61, %v1777_v1  ;;  %v882_v1 = vmul.f32 1.442695, %v878_v2  ;;  %v1382_v61 = vpop.f32.mrb[36].mxu0 }
 0x236   :  { %v486_v62 = vpop.xlane.xlu1 %485  ;;  %v831_v30 = vpop.f32.mrb[37].mxu0 }
 0x237   :  { %v549_v38 = vmul.f32 %v486_v62, %v1774_v0  ;;  %v1468_v0 = vpop.eup %1467  ;;  %1471 = vpow2.f32 %v882_v1  ;;  %v1383_v62 = vpop.f32.mrb[38].mxu0 }
 0x238   :  { %v1470_v7 = vpop.eup %1469  ;;  %v917_v11 = vsel %vm897_vm12, %v901_v8, %v1468_v0  ;;  %1473 = vpow2.f32 %v884_v15  ;;  %v489_v39 = vpop.xlane.xlu0 %488 }
 0x239   :  { %v1822_v63 = vpack.c.bf16 %v549_v38, %v548_v33  ;;  %v915_v16 = vsel %vm895_vm13, %v899_v14, %v1470_v7  ;;  %v1828_v12 = vpack.c.bf16 %v917_v11, %v916_v6  ;;  %v1000_v20 = vsel %vm90_vm1, %v917_v11, 0.0  ;;  %v834_v38 = vpop.f32.mrb[39].mxu0 }
 0x23a   :  { %v994_v17 = vsel %vm90_vm1, %v915_v16, 0.0  ;;  %v1831_v18 = vpack.c.bf16 %v915_v16, %v914_v10  ;;  %v550_v58 = vmul.f32 %v489_v39, %v1788_v47  ;;  %v923_v33 = vpack.c.bf16 %v1383_v62, %v1382_v61 }
 0x23b   :  { %1344 = vmatprep.subr.bf16.mxu1 %v1822_v63  ;;  %995 = vadd.xlane.f32.xlu0 %v994_v17 }
 0x23c   :  { %v492_v48 = vpop.xlane.xlu0 %491 }
 0x23d   :  { %v551_v56 = vmul.f32 %v492_v48, %v1785_v13 }
 0x23f   :  { %1001 = vadd.xlane.f32.xlu0 %v1000_v20  ;;  %v553_v31 = vpack.c.bf16 %v551_v56, %v550_v58 }
 0x241   :  { %v1472_v23 = vpop.eup %1471 }
 0x242   :  { %v1474_v5 = vpop.eup %1473  ;;  %v890_v25 = vsel %vm870_vm14, %v874_v22, %v1472_v23 }
 0x243   :  { %v891_v36 = vsel %vm871_vm15, %v875_v32, %v1474_v5  ;;  %v880_v5 = vmin.f32 %v1802_v21, 0.0  ;;  %v881_v32 = vmin.f32 %v1808_v26, 0.0 }
 0x244   :  { %v1839_v37 = vpack.c.bf16 %v891_v36, %v890_v25 }
 0x245   :  { %v888_v39 = vmul.f32 1.442695, %v881_v32 }
 0x264   :  { %v993_v13 = vpop.xlane.xlu1 %992 }
 0x265   :  { %v1058_v59 = vmul.f32 %v993_v13, %v890_v25  ;;  %v1885_v25 = vld [vmem:[%s1952_s3 + $0x8] sm:$0xff]   ;;  %s1547_s3 = smov [#allocation5]  }
 0x266   :  { %s1182_s23 = sshll.u32 %s1547_s3, 4  ;;  %s1183_s23 = int_to_ptr.vmem [resolvable:$true] %s1182_s23 }
 0x267   :  { %s1517_s24 = scalar_lea.vmem %s1183_s23, 1024  ;;  %p1522_p9 = scmp.lt.s32.totalorder %s1183_s23, %s1183_s23 }
 0x268   :  { %p1518_p8 = scmp.ne.s32.totalorder %s1183_s23, %s1517_s24  ;;  %p1523_p10 = scmp.lt.s32.totalorder %s1517_s24, %s1517_s24 }
 0x26a   :  { %p1524_p11 = por %p1523_p10, %p1522_p9 }
 0x26c   :  { %p1525_p12 = pnand %p1524_p11, %p1518_p8 }
 0x28d   :  { %v1334_v44 = vpop.f32.mrb[0].mxu1 }
 0x28e   :  { %v456_v46 = vpop.f32.mrb[1].mxu1  ;;  %v477_v52 = vmul.f32 %v1334_v44, %v473_v24  ;;  %v931_v44 = vsel %vm90_vm1, %v1831_v18, 0 }
 0x28f   :  { %v1335_v51 = vpop.f32.mrb[2].mxu1  ;;  %v475_v55 = vmul.f32 %v471_v34, %v456_v46  ;;  %v934_v46 = vsel %vm90_vm1, %v1828_v12, 0 }
 0x290   :  { %v478_v53 = vmul.f32 %v1335_v51, %v474_v42  ;;  %v459_v54 = vpop.f32.mrb[3].mxu1  ;;  %v876_v51 = vadd.f32 1.0, %v1802_v21 }
 0x291   :  { %v476_v27 = vmul.f32 %v472_v45, %v459_v54 }
 0x292   :  { %v480_v29 = vpack.c.bf16 %v478_v53, %v477_v52  ;;  %v877_v52 = vadd.f32 1.0, %v1808_v26 }
 0x293   :  { %v479_v57 = vpack.c.bf16 %v476_v27, %v475_v55 }
 0x295   :  { %1340 = vmatprep.mubr.msk.bf16.mxu1 %vm188_vm0, %v479_v57 }
 0x296   :  { %1341 = vmatmul.mubr.msk.bf16.vlgmr.msra.gmra.mrb[4].mxu1 %vm188_vm0, %v480_v29  ;;  %v999_v29 = vpop.xlane.xlu1 %998 }
 0x297   :  { %1345 = vmatpush3.bf16.msra.mxu1 %v1822_v63  ;;  %1348 = vmatprep.mubr.msk.bf16.mxu1 %vm188_vm0, %v1849_v41  ;;  %v922_v63 = vpack.c.bf16 %v834_v38, %v831_v30 }
 0x298   :  { %1346 = vmatprep.subr.bf16.mxu1 %v553_v31 }
 0x29b   :  { %1347 = vmatpush3.bf16.msra.mxu1 %v553_v31 }
 0x29e   :  { %1349 = vmatmul.mubr.msk.bf16.vlgmr.msra.gmra.mrb[8].mxu1 %vm188_vm0, %v1844_v40 }
 0x29f   :  { %1356 = vmatprep.mubr.msk.bf16.mxu1 %vm188_vm0, %v1877_v35 }
 0x2c8   :  { %v996_v28 = vpop.xlane.xlu0 %995 }
 0x2c9   :  { %v1059_v60 = vmul.f32 %v996_v28, %v891_v36  ;;  %v886_v36 = vmul.f32 1.442695, %v880_v5 }
 0x2cb   :  { %v1872_v47 = vpack.c.bf16 %v1059_v60, %v1058_v59 }
 0x369   :  { %v1342_v2 = vpop.f32.mrb[4].mxu1 }
 0x36a   :  { %v533_v3 = vpop.f32.mrb[5].mxu1 }
 0x36b   :  { %v1343_v4 = vpop.f32.mrb[6].mxu1 }
 0x36c   :  { %v536_v50 = vpop.f32.mrb[7].mxu1 }
 0x371   :  { %v1350_v8 = vpop.f32.mrb[8].mxu1 }
 0x372   :  { %v613_v9 = vadd.f32 1e-06, %v1350_v8  ;;  %v604_v14 = vpop.f32.mrb[9].mxu1 }
 0x373   :  { %v605_v49 = vadd.f32 1e-06, %v604_v14  ;;  %v1351_v1 = vpop.f32.mrb[10].mxu1 }
 0x374   :  { %1475 = vrcp.f32 %v613_v9  ;;  %v616_v0 = vadd.f32 1e-06, %v1351_v1  ;;  %v607_v10 = vpop.f32.mrb[11].mxu1 }
 0x375   :  { %1477 = vrcp.f32 %v605_v49  ;;  %v608_v6 = vadd.f32 1e-06, %v607_v10 }
 0x376   :  { %1479 = vrcp.f32 %v616_v0 }
 0x377   :  { %1481 = vrcp.f32 %v608_v6 }
 0x378   :  { %1483 = vpow2.f32 %v886_v36 }
 0x379   :  { %1485 = vpow2.f32 %v888_v39 }
 0x37e   :  { %v1476_v7 = vpop.eup %1475 }
 0x37f   :  { %v1478_v15 = vpop.eup %1477  ;;  %v625_v43 = vmul.f32 %v1476_v7, %v1342_v2 }
 0x380   :  { %v1480_v11 = vpop.eup %1479  ;;  %v623_v16 = vmul.f32 %v1478_v15, %v533_v3 }
 0x381   :  { %v1482_v17 = vpop.eup %1481  ;;  %v626_v19 = vmul.f32 %v1480_v11, %v1343_v4 }
 0x382   :  { %v624_v20 = vmul.f32 %v1482_v17, %v536_v50  ;;  %v1484_v48 = vpop.eup %1483 }
 0x383   :  { %v628_v22 = vpack.c.bf16 %v626_v19, %v625_v43  ;;  %v1486_v53 = vpop.eup %1485 }
 0x384   :  { %v627_v23 = vpack.c.bf16 %v624_v20, %v623_v16  ;;  %v893_v54 = vsel %vm873_vm3, %v877_v52, %v1486_v53 }
 0x386   :  { %1352 = vmatprep.subr.bf16.mxu1 %v627_v23 }
 0x387   :  { %1353 = vmatpush3.bf16.msra.mxu1 %v627_v23 }
 0x388   :  { %1354 = vmatprep.subr.bf16.mxu1 %v628_v22 }
 0x38b   :  { %1355 = vmatpush3.bf16.msra.mxu1 %v628_v22 }
 0x38c   :  { %1418 = vmatprep.subr.msk.bf16.mxu1 %vm90_vm1, %v1831_v18  ;;  %v892_v18 = vsel %vm872_vm2, %v876_v51, %v1484_v48 }
 0x38d   :  { %v919_v55 = vpack.c.bf16 %v893_v54, %v892_v18  ;;  %v1060_v61 = vmul.f32 %v999_v29, %v892_v18 }
 0x38e   :  { %1357 = vmatmul.mubr.msk.bf16.vlgmr.msra.gmra.mrb[12].mxu1 %vm188_vm0, %v1885_v25 }
 0x38f   :  { %1388 = vmatprep.mubr.msk.bf16.mxu1 %vm90_vm1, %v922_v63 }
 0x394   :  { %1385 = vmatpush3.bf16.xpose.msra.mxu1 %v931_v44 }
 0x395   :  { %1419 = vmatprep.subr.msk.bf16.mxu1 %vm90_vm1, %v1828_v12 }
 0x39c   :  { %1387 = vmatpush3.bf16.xpose.msra.mxu1 %v934_v46 }
 0x39d   :  { %1392 = vmatprep.subr.bf16.mxu1 %v1839_v37 }
 0x3a3   :  { %1389 = vmatmul.mubr.msk.bf16.vlgmr.msra.gmra.mrb[16].mxu1 %vm90_vm1, %v923_v33 }
 0x3a4   :  { %1393 = vmatpush3.bf16.msra.mxu1 %v1839_v37  ;;  %v1002_v37 = vpop.xlane.xlu0 %1001 }
 0x3a5   :  { %1394 = vmatprep.subr.bf16.mxu1 %v919_v55  ;;  %v1061_v30 = vmul.f32 %v1002_v37, %v893_v54 }
 0x3a7   :  { %v1063_v38 = vpack.c.bf16 %v1061_v30, %v1060_v61 }
 0x3a8   :  { %1395 = vmatpush3.bf16.msra.mxu1 %v919_v55 }
 0x3a9   :  { %1400 = vmatprep.subr.bf16.mxu1 %v1872_v47 }
 0x461   :  { %v1358_v12 = vpop.f32.mrb[12].mxu1 }
 0x462   :  { %696 = vst.msk [vmem:[#allocation5 + $0x10] sm:$0xff] %vm90_vm1, %v1358_v12  ;;  %v679_v27 = vpop.f32.mrb[13].mxu1 }
 0x463   :  { %694 = vst.msk [vmem:[#allocation5] sm:$0xff] %vm90_vm1, %v679_v27  ;;  %v1359_v21 = vpop.f32.mrb[14].mxu1 }
 0x464   :  { %697 = vst.msk [vmem:[#allocation5 + $0x18] sm:$0xff] %vm90_vm1, %v1359_v21  ;;  %v682_v26 = vpop.f32.mrb[15].mxu1 }
 0x465   :  { %695 = vst.msk [vmem:[#allocation5 + $0x8] sm:$0xff] %vm90_vm1, %v682_v26 }
 0x476   :  { %v1390_v56 = vpop.f32.mrb[16].mxu1 }
 0x477   :  { %v970_v57 = vpop.f32.mrb[17].mxu1  ;;  %v987_v31 = vmul.f32 %v1390_v56, %v473_v24 }
 0x478   :  { %v1391_v58 = vpop.f32.mrb[18].mxu1  ;;  %v985_v28 = vmul.f32 %v970_v57, %v471_v34 }
 0x479   :  { %v988_v13 = vmul.f32 %v1391_v58, %v474_v42  ;;  %v973_v59 = vpop.f32.mrb[19].mxu1 }
 0x47a   :  { %v986_v60 = vmul.f32 %v973_v59, %v472_v45 }
 0x47b   :  { %v990_v62 = vpack.c.bf16 %v988_v13, %v987_v31 }
 0x47c   :  { %v989_v33 = vpack.c.bf16 %v986_v60, %v985_v28 }
 0x47e   :  { %1396 = vmatprep.mubr.msk.bf16.mxu1 %vm188_vm0, %v989_v33 }
 0x47f   :  { %1397 = vmatmul.mubr.msk.bf16.vlgmr.msra.gmra.mrb[20].mxu1 %vm188_vm0, %v990_v62 }
 0x480   :  { %1401 = vmatpush3.bf16.msra.mxu1 %v1872_v47  ;;  %1404 = vmatprep.mubr.msk.bf16.mxu1 %vm188_vm0, %v1849_v41 }
 0x481   :  { %1402 = vmatprep.subr.bf16.mxu1 %v1063_v38 }
 0x484   :  { %1403 = vmatpush3.bf16.msra.mxu1 %v1063_v38 }
 0x487   :  { %1405 = vmatmul.mubr.msk.bf16.vlgmr.msra.gmra.mrb[24].mxu1 %vm188_vm0, %v1844_v40 }
 0x488   :  { %1412 = vmatprep.mubr.msk.bf16.mxu1 %vm188_vm0, %v1877_v35 }
 0x552   :  { %v1398_v24 = vpop.f32.mrb[20].mxu1 }
 0x553   :  { %v1043_v42 = vpop.f32.mrb[21].mxu1 }
 0x554   :  { %v1399_v34 = vpop.f32.mrb[22].mxu1 }
 0x555   :  { %v1046_v45 = vpop.f32.mrb[23].mxu1 }
 0x55a   :  { %v1406_v63 = vpop.f32.mrb[24].mxu1 }
 0x55b   :  { %v1107_v2 = vadd.f32 1e-06, %v1406_v63  ;;  %v1098_v3 = vpop.f32.mrb[25].mxu1 }
 0x55c   :  { %v1099_v4 = vadd.f32 1e-06, %v1098_v3  ;;  %v1407_v47 = vpop.f32.mrb[26].mxu1 }
 0x55d   :  { %1487 = vrcp.f32 %v1107_v2  ;;  %v1110_v50 = vadd.f32 1e-06, %v1407_v47  ;;  %v1101_v41 = vpop.f32.mrb[27].mxu1 }
 0x55e   :  { %1489 = vrcp.f32 %v1099_v4  ;;  %v1102_v8 = vadd.f32 1e-06, %v1101_v41 }
 0x55f   :  { %1491 = vrcp.f32 %v1110_v50 }
 0x560   :  { %1493 = vrcp.f32 %v1102_v8 }
 0x567   :  { %v1488_v40 = vpop.eup %1487 }
 0x568   :  { %v1490_v9 = vpop.eup %1489  ;;  %v1119_v14 = vmul.f32 %v1488_v40, %v1398_v24 }
 0x569   :  { %v1492_v35 = vpop.eup %1491  ;;  %v1117_v49 = vmul.f32 %v1490_v9, %v1043_v42 }
 0x56a   :  { %v1494_v1 = vpop.eup %1493  ;;  %v1120_v0 = vmul.f32 %v1492_v35, %v1399_v34 }
 0x56b   :  { %v1118_v10 = vmul.f32 %v1494_v1, %v1046_v45 }
 0x56c   :  { %v1122_v6 = vpack.c.bf16 %v1120_v0, %v1119_v14 }
 0x56d   :  { %v1121_v7 = vpack.c.bf16 %v1118_v10, %v1117_v49 }
 0x56f   :  { %1408 = vmatprep.subr.bf16.mxu1 %v1121_v7 }
 0x570   :  { %1409 = vmatpush3.bf16.msra.mxu1 %v1121_v7 }
 0x571   :  { %1410 = vmatprep.subr.bf16.mxu1 %v1122_v6 }
 0x574   :  { %1411 = vmatpush3.bf16.msra.mxu1 %v1122_v6 }
 0x577   :  { %1413 = vmatmul.mubr.msk.bf16.vlgmr.msra.gmra.mrb[28].mxu1 %vm188_vm0, %v1885_v25 }
 0x64a   :  { %v1414_v15 = vpop.f32.mrb[28].mxu1 }
 0x64b   :  { %1175 = vst.msk [vmem:[#allocation5 + $0x30] sm:$0xff] %vm90_vm1, %v1414_v15  ;;  %v1157_v43 = vpop.f32.mrb[29].mxu1 }
 0x64c   :  { %1173 = vst.msk [vmem:[#allocation5 + $0x20] sm:$0xff] %vm90_vm1, %v1157_v43  ;;  %v1415_v11 = vpop.f32.mrb[30].mxu1 }
 0x64d   :  { %1176 = vst.msk [vmem:[#allocation5 + $0x38] sm:$0xff] %vm90_vm1, %v1415_v11  ;;  %v1160_v16 = vpop.f32.mrb[31].mxu1 }
 0x64e   :  { %1174 = vst.msk [vmem:[#allocation5 + $0x28] sm:$0xff] %vm90_vm1, %v1160_v16 }
 0x64f   :  { %1528 = shalt.err (!%p1525_p12)
}
 0x650   :  { %s1529_s27 = scalar_lea.hbm %s1956_s7, 1024 }
 0x651   :  { %p1530_p13 = scmp.ne.s32.totalorder %s1956_s7, %s1529_s27  ;;  %p1533_p0 = scmp.lt.u32.totalorder %s1529_s27, %s1956_s7 }
 0x653   :  { %p1535_p1 = pnand %p1533_p0, %p1530_p13 }
 0x655   :  { %1538 = shalt.err (!%p1535_p1)
}
 0x656   :  { %1188 = dma.vmem_to_hbm [thread:$0]  %s1183_s23, 1024, %s1956_s7, [#allocation4], %s1544_s11, %s1544_s11, %s1545_s12  }
 0x657   :  { %1541 = dma.done.wait [#allocation4], 1024  }
 0x658   :  { %1542 = vsyncadd [#allocation4], 4294966272 }
 0x659   :  { %1192 = vsyncpa [#allocation3], 1 }
 0x65a   :  { %1193 = vsyncpa [#allocation4], 1 }

</bundles_post_ra>
